<compile_context>
chip_gen: v7x
topology: tpu7x:2x2x1
jax: 0.10.0
libtpu: 0.0.40
codegen_flags: <defaults>
</compile_context>

<pallas_src>
import functools

import jax
import jax.numpy as jnp
from jax import lax
from jax.experimental import pallas as pl
from jax.experimental.pallas import tpu as pltpu

_LANES = 128


def _dice_from_sums(tp, s_yp, s_yt, delta, epsilon):
    fn = s_yt - tp          # sum(yt * (1 - yp)) == sum(yt) - tp
    fp = s_yp - tp          # sum((1 - yt) * yp) == sum(yp) - tp
    return (tp + epsilon) / (tp + delta * fn + (1.0 - delta) * fp + epsilon)


def _aftl_dice_kernel(yp_ref, yt_ref, dice_ref, *acc_refs,
                      delta, epsilon, hw, tile_rows, needs_mask):
    """One grid step: reduce one (tile_rows, 128) spatial tile of one (n, c)."""
    k = pl.program_id(1)

    yp = yp_ref[0].astype(jnp.float32)
    yt = yt_ref[0].astype(jnp.float32)
    yp = jnp.clip(yp, epsilon, 1.0 - epsilon)   # torch.clamp equivalent

    if needs_mask:
        # Spatial extent was zero-padded up to a multiple of tile_rows*128 in
        # the wrapper.  y_true pads are already zero; y_pred pads become
        # `epsilon` after the clip, so mask them back to exactly zero.
        row = lax.broadcasted_iota(jnp.int32, (tile_rows, _LANES), 0)
        lane = lax.broadcasted_iota(jnp.int32, (tile_rows, _LANES), 1)
        idx = (k * tile_rows + row) * _LANES + lane
        yp = jnp.where(idx < hw, yp, 0.0)

    if not acc_refs:
        # Single spatial tile per (n, c): reduce directly, no accumulator.
        tp = jnp.sum(yt * yp)
        s_yp = jnp.sum(yp)
        s_yt = jnp.sum(yt)
        dice = _dice_from_sums(tp, s_yp, s_yt, delta, epsilon)
        dice_ref[...] = jnp.broadcast_to(dice, dice_ref.shape)
    else:
        tp_acc, syp_acc, syt_acc = acc_refs

        @pl.when(k == 0)
        def _init():
            tp_acc[...] = jnp.zeros_like(tp_acc)
            syp_acc[...] = jnp.zeros_like(syp_acc)
            syt_acc[...] = jnp.zeros_like(syt_acc)

        # Partial per-step reductions: one VALU add per vreg per quantity plus
        # a tiny sublane reduce; accumulators stay (1, 128) f32.
        tp_acc[...] += jnp.sum(yt * yp, axis=0, keepdims=True)
        syp_acc[...] += jnp.sum(yp, axis=0, keepdims=True)
        syt_acc[...] += jnp.sum(yt, axis=0, keepdims=True)

        @pl.when(k == pl.num_programs(1) - 1)
        def _finalize():
            tp = jnp.sum(tp_acc[...])
            s_yp = jnp.sum(syp_acc[...])
            s_yt = jnp.sum(syt_acc[...])
            dice = _dice_from_sums(tp, s_yp, s_yt, delta, epsilon)
            dice_ref[...] = jnp.broadcast_to(dice, dice_ref.shape)


def asymmetric_focal_tversky_loss(y_pred, y_true, delta=0.7, gamma=0.75,
                                  epsilon=1e-07, max_tile_rows=2048):
    """Forward pass matching AsymmetricFocalTverskyLoss (NCHW or NCDHW)."""
    if y_pred.ndim not in (4, 5):
        raise ValueError('Metric: Shape of tensor is neither 2D nor 3D.')
    assert y_pred.shape == y_true.shape
    assert max_tile_rows % 8 == 0

    N, C = y_pred.shape[0], y_pred.shape[1]
    assert C >= 2, "loss uses channel 0 = background, channel 1 = foreground"
    hw = 1
    for d in y_pred.shape[2:]:
        hw *= int(d)
    NC = N * C

    # Lane/sublane-dense spatial layout: (N*C, rows, 128).
    r_total = pl.cdiv(hw, _LANES)
    tile_rows = r_total if r_total <= max_tile_rows else max_tile_rows
    if tile_rows % 8 != 0:
        tile_rows = ((tile_rows + 7) // 8) * 8      # keep (8, 128) alignment
    num_k = pl.cdiv(r_total, tile_rows)
    r_pad = num_k * tile_rows
    hw_pad = r_pad * _LANES
    needs_mask = hw_pad != hw
    multi_step = num_k > 1

    def prep(x):
        x = x.reshape(NC, hw)                       # keep native dtype (no upcast)
        if needs_mask:
            x = jnp.pad(x, ((0, 0), (0, hw_pad - hw)))
        return x.reshape(NC, r_pad, _LANES)

    yp = prep(y_pred)
    yt = prep(y_true)

    kernel = functools.partial(
        _aftl_dice_kernel,
        delta=float(delta), epsilon=float(epsilon),
        hw=hw, tile_rows=tile_rows, needs_mask=needs_mask)

    scratch_shapes = (
        [pltpu.VMEM((1, _LANES), jnp.float32)] * 3 if multi_step else [])

    dice = pl.pallas_call(
        kernel,
        out_shape=jax.ShapeDtypeStruct((NC, 1, _LANES), jnp.float32),
        grid_spec=pltpu.PrefetchScalarGridSpec(
            num_scalar_prefetch=0,
            grid=(NC, num_k),
            in_specs=[
                pl.BlockSpec((1, tile_rows, _LANES), lambda nc, k: (nc, k, 0)),
                pl.BlockSpec((1, tile_rows, _LANES), lambda nc, k: (nc, k, 0)),
            ],
            out_specs=pl.BlockSpec((1, 1, _LANES), lambda nc, k: (nc, 0, 0)),
            scratch_shapes=scratch_shapes,
        ),
        compiler_params=pltpu.CompilerParams(
            dimension_semantics=("parallel", "arbitrary")),
    )(yp, yt)

    dice = dice[:, 0, 0].reshape(N, C)               # dice_class, (N, C)
    back_dice = 1.0 - dice[:, 0]
    # NOTE: NaN if dice[:, 1] == 1.0 exactly — same as the PyTorch reference.
    fore_dice = (1.0 - dice[:, 1]) * jnp.power(1.0 - dice[:, 1], -gamma)
    return jnp.mean(jnp.stack([back_dice, fore_dice], axis=-1))


def _reference_loss(y_pred, y_true, delta=0.7, gamma=0.75, epsilon=1e-07):
    """Pure-jnp reference mirroring the PyTorch forward."""
    axis = tuple(range(2, y_pred.ndim))
    yp = jnp.clip(y_pred.astype(jnp.float32), epsilon, 1.0 - epsilon)
    yt = y_true.astype(jnp.float32)
    tp = jnp.sum(yt * yp, axis=axis)
    fn = jnp.sum(yt * (1.0 - yp), axis=axis)
    fp = jnp.sum((1.0 - yt) * yp, axis=axis)
    dice = (tp + epsilon) / (tp + delta * fn + (1.0 - delta) * fp + epsilon)
    back = 1.0 - dice[:, 0]
    fore = (1.0 - dice[:, 1]) * jnp.power(1.0 - dice[:, 1], -gamma)
    return jnp.mean(jnp.stack([back, fore], axis=-1))


if __name__ == "__main__":
    key = jax.random.PRNGKey(0)

    def make_inputs(k, N, C, spatial):
        k1, k2 = jax.random.split(k)
        logits = jax.random.normal(k1, (N, C) + spatial, jnp.float32)
        y_pred = jax.nn.softmax(logits, axis=1)                 # probs over channels
        labels = jax.random.randint(k2, (N,) + spatial, 0, C)
        y_true = jax.nn.one_hot(labels, C, axis=1, dtype=jnp.float32)
        return y_pred, y_true

    configs = [
        dict(N=2, C=2, spatial=(16, 16), max_tile_rows=2048),  # single-tile path
        dict(N=2, C=2, spatial=(64, 64), max_tile_rows=8),     # tiled reduction path
        dict(N=2, C=2, spatial=(10, 10), max_tile_rows=2048),  # padded / masked path
        dict(N=2, C=2, spatial=(40, 40), max_tile_rows=8),     # tiled + masked path
        dict(N=1, C=2, spatial=(4, 8, 12), max_tile_rows=2048),  # 3D (NCDHW) path
    ]
    keys = jax.random.split(key, len(configs))
    for cfg, k in zip(configs, keys):
        y_pred, y_true = make_inputs(k, cfg["N"], cfg["C"], cfg["spatial"])
        loss = asymmetric_focal_tversky_loss(
            y_pred, y_true, max_tile_rows=cfg["max_tile_rows"])
        loss = jax.block_until_ready(loss)
        ref = _reference_loss(y_pred, y_true)
        assert jnp.allclose(loss, ref, rtol=1e-5, atol=1e-6), (cfg, loss, ref)

    print("KERNEL_OK")
</pallas_src>

<mosaic_0001>
module attributes {stable_mosaic.version = 11 : i64} {
  func.func @_aftl_dice_kernel(%arg0: i32, %arg1: i32, %arg2: memref<1x8x128xf32, #tpu.memory_space<vmem>>, %arg3: memref<1x8x128xf32, #tpu.memory_space<vmem>>, %arg4: memref<1x1x128xf32, #tpu.memory_space<vmem>>) attributes {dimension_semantics = [#tpu.dimension_semantics<parallel>, #tpu.dimension_semantics<arbitrary>], iteration_bounds = array<i64: 4, 1>, scalar_prefetch = 0 : i64, scratch_operands = 0 : i64, tpu.core_type = #tpu.core_type<tc>, window_params = [{transform_indices = @transform_0, window_bounds = array<i64: 1, 8, 128>}, {transform_indices = @transform_1, window_bounds = array<i64: 1, 8, 128>}, {transform_indices = @transform_2, window_bounds = array<i64: 1, 1, 128>}]} {
    %c0 = arith.constant 0 : index
    %c0_0 = arith.constant 0 : index
    %c0_1 = arith.constant 0 : index
    %0 = vector.load %arg2[%c0, %c0_0, %c0_1] : memref<1x8x128xf32, #tpu.memory_space<vmem>>, vector<1x8x128xf32>
    %1 = vector.shape_cast %0 : vector<1x8x128xf32> to vector<8x128xf32>
    %c0_2 = arith.constant 0 : index
    %c0_3 = arith.constant 0 : index
    %c0_4 = arith.constant 0 : index
    %2 = vector.load %arg3[%c0_2, %c0_3, %c0_4] : memref<1x8x128xf32, #tpu.memory_space<vmem>>, vector<1x8x128xf32>
    %3 = vector.shape_cast %2 : vector<1x8x128xf32> to vector<8x128xf32>
    %cst = arith.constant 1.000000e-07 : f32
    %cst_5 = arith.constant 0.99999988 : f32
    %4 = vector.broadcast %cst : f32 to vector<8x128xf32>
    %5 = arith.maximumf %4, %1 : vector<8x128xf32>
    %6 = vector.broadcast %cst_5 : f32 to vector<8x128xf32>
    %7 = arith.minimumf %6, %5 : vector<8x128xf32>
    %8 = tpu.iota {dimensions = array<i32: 0>} : vector<8x128xi32>
    %9 = tpu.iota {dimensions = array<i32: 1>} : vector<8x128xi32>
    %c8_i32 = arith.constant 8 : i32
    %10 = arith.muli %arg1, %c8_i32 : i32
    %11 = vector.broadcast %10 : i32 to vector<8x128xi32>
    %12 = arith.addi %11, %8 : vector<8x128xi32>
    %c128_i32 = arith.constant 128 : i32
    %13 = vector.broadcast %c128_i32 : i32 to vector<8x128xi32>
    %14 = arith.muli %12, %13 : vector<8x128xi32>
    %15 = arith.addi %14, %9 : vector<8x128xi32>
    %c256_i32 = arith.constant 256 : i32
    %16 = vector.broadcast %c256_i32 : i32 to vector<8x128xi32>
    %17 = arith.cmpi slt, %15, %16 : vector<8x128xi32>
    %cst_6 = arith.constant 0.000000e+00 : f32
    %18 = vector.broadcast %cst_6 : f32 to vector<8x128xf32>
    %19 = arith.select %17, %7, %18 : vector<8x128xi1>, vector<8x128xf32>
    %20 = arith.mulf %3, %19 : vector<8x128xf32>
    %21 = vector.shape_cast %20 : vector<8x128xf32> to vector<1x8x128xf32>
    %cst_7 = arith.constant dense<0.000000e+00> : vector<1xf32>
    %22 = vector.multi_reduction <add>, %21, %cst_7 [1, 2] : vector<1x8x128xf32> to vector<1xf32>
    %23 = vector.shape_cast %22 : vector<1xf32> to vector<1x1x1xf32>
    %24 = vector.extract %23[0, 0, 0] : f32 from vector<1x1x1xf32>
    %25 = vector.shape_cast %19 : vector<8x128xf32> to vector<1x8x128xf32>
    %cst_8 = arith.constant dense<0.000000e+00> : vector<1xf32>
    %26 = vector.multi_reduction <add>, %25, %cst_8 [1, 2] : vector<1x8x128xf32> to vector<1xf32>
    %27 = vector.shape_cast %26 : vector<1xf32> to vector<1x1x1xf32>
    %28 = vector.extract %27[0, 0, 0] : f32 from vector<1x1x1xf32>
    %29 = vector.shape_cast %3 : vector<8x128xf32> to vector<1x8x128xf32>
    %cst_9 = arith.constant dense<0.000000e+00> : vector<1xf32>
    %30 = vector.multi_reduction <add>, %29, %cst_9 [1, 2] : vector<1x8x128xf32> to vector<1xf32>
    %31 = vector.shape_cast %30 : vector<1xf32> to vector<1x1x1xf32>
    %32 = vector.extract %31[0, 0, 0] : f32 from vector<1x1x1xf32>
    %33 = arith.subf %32, %24 : f32
    %34 = arith.subf %28, %24 : f32
    %cst_10 = arith.constant 1.000000e-07 : f32
    %35 = arith.addf %24, %cst_10 : f32
    %cst_11 = arith.constant 0.699999988 : f32
    %36 = arith.mulf %cst_11, %33 : f32
    %37 = arith.addf %24, %36 : f32
    %cst_12 = arith.constant 3.000000e-01 : f32
    %38 = arith.mulf %cst_12, %34 : f32
    %39 = arith.addf %37, %38 : f32
    %cst_13 = arith.constant 1.000000e-07 : f32
    %40 = arith.addf %39, %cst_13 : f32
    %41 = arith.divf %35, %40 : f32
    %42 = vector.broadcast %41 : f32 to vector<1x1x128xf32>
    %c0_14 = arith.constant 0 : index
    %c0_15 = arith.constant 0 : index
    %c0_16 = arith.constant 0 : index
    %43 = vector.load %arg4[%c0_14, %c0_15, %c0_16] : memref<1x1x128xf32, #tpu.memory_space<vmem>>, vector<1x1x128xf32>
    tpu.vector_store %arg4[%c0_14, %c0_15, %c0_16], %42 {strides = array<i32>} : memref<1x1x128xf32, #tpu.memory_space<vmem>>, vector<1x1x128xf32>,
    return
  }
  func.func @transform_0(%arg0: i32, %arg1: i32) -> (i32, i32, i32) {
    %c0_i32 = arith.constant 0 : i32
    %c0_i32_0 = arith.constant 0 : i32
    return %arg0, %arg1, %c0_i32 : i32, i32, i32
  }
  func.func @transform_1(%arg0: i32, %arg1: i32) -> (i32, i32, i32) {
    %c0_i32 = arith.constant 0 : i32
    %c0_i32_0 = arith.constant 0 : i32
    return %arg0, %arg1, %c0_i32 : i32, i32, i32
  }
  func.func @transform_2(%arg0: i32, %arg1: i32) -> (i32, i32, i32) {
    %c0_i32 = arith.constant 0 : i32
    %c0_i32_0 = arith.constant 0 : i32
    %c0_i32_1 = arith.constant 0 : i32
    return %arg0, %c0_i32, %c0_i32_0 : i32, i32, i32
  }
}

</mosaic_0001>

<bundles_post_ra>
// kernel: tpu_custom_call.1
= control target key start
LH: loop header
LB: loop body
LE: loop exit
PB: predicated region body
PF: predicated region fallthrough
CT: control target
= control target key end

     0   :  { %7 = vsyncpa [#allocation3], 0  ;;  %s858_s0 = inlined_call_operand.hbm [shape: f32[4,8,128], index: 0, kind: input, shape index: {}]   ;;  %s859_s1 = inlined_call_operand.hbm [shape: f32[4,8,128], index: 1, kind: input, shape index: {}]   ;;  %s860_s2 = inlined_call_operand.hbm [shape: f32[4,1,128], index: 2, kind: output, shape index: {}]  }
   0x1   :  { %9 = vsyncpa [#allocation3 + $0x1], 0 }
   0x2   :  { %10 = vsyncpa [#allocation6], 0 }
   0x3   :  { %12 = vsyncpa [#allocation6 + $0x1], 0 }
   0x4   :  { %13 = vsyncpa [#allocation4], 0 }
   0x5   :  { %15 = vsyncpa [#allocation4 + $0x1], 0  ;;  %s639_s9 = smov 0   ;;  %s641_s10 = smov 0  }
   0x6   :  { %s643_s11 = smov 0   ;;  %s645_s12 = smov 0  }
   0x7   :  { %s647_s13 = smov 0   ;;  %s649_s14 = smov 0  }
   0x8 LB: > { %s382_s15 = sadd.s32 4294967295, %s619_s14   ;;  %s383_s16 = sadd.s32 4294967294, %s619_s14   ;;  %s619_s14 = sphi %s649_s14, %s21_s14   ;;  %s615_s13 = sphi %s647_s13, %s879_s13   ;;  %s611_s12 = sphi %s645_s12, %s878_s12   ;;  %s607_s11 = sphi %s643_s11, %s877_s11   ;;  %s603_s10 = sphi %s641_s10, %s876_s10   ;;  %s599_s9 = sphi %s639_s9, %s875_s9  }
   0x9   : > { %s33_s17 = sadd.s32 1, %s615_s13  ;;  %s42_s18 = sadd.s32 1, %s607_s11 }
   0xa   : > { %p35_p0 = scmp.ge.s32.totalorder %s33_s17, 4  ;;  %p49_p1 = scmp.ne.s32.totalorder %s607_s11, %s603_s10 }
   0xb   : > { %p50_p2 = scmp.eq.s32.totalorder %s619_s14, 0  ;;  %p55_p3 = scmp.ne.s32.totalorder %s603_s10, %s599_s9 }
   0xc   : > { %s881_s17 = smov (%p35_p0, %s33_s17), 0  ;;  %p56_p5 = scmp.eq.s32.totalorder %s382_s15, 0 }
   0xd   : > { %p680_p4 = por %p50_p2, %p49_p1  ;;  %s37_s20 = ssub.s32 %s615_s13, %s881_s17 }
   0xe   : > { %p107_p6 = scmp.eq.s32.totalorder %s382_s15, 3  ;;  %p40_p7 = scmp.eq.s32.totalorder %s37_s20, 0 }
   0xf   : > { %p686_p8 = por %p56_p5, %p55_p3  ;;  %p113_p10 = scmp.eq.s32.totalorder %s383_s16, 3 }
  0x10   : > { %p690_p9 = por %p107_p6, %p49_p1  ;;  %p421_p12 = scmp.lt.s32.totalorder %s619_s14, 4 }
  0x11   : > { %s864_s21 = scalar_select %p686_p8, 1, 0 }
  0x12   : > { %s865_s22 = scalar_select %p690_p9, 1, 0 }
  0x13   : > { %s695_s23 = scalar_select %p40_p7, %s607_s11, %s42_s18  }
  0x14   : > { %p697_p11 = por %p113_p10, %p55_p3  ;;  %s703_s25 = sand.u32 1, %s607_s11  }
  0x15   : > { %s386_s26 = sshll.u32 %s703_s25, 3  ;;  %s387_s27 = sshll.u32 %s615_s13, 7 }
  0x16   : > { %s866_s24 = scalar_select %p697_p11, 1, 0 }
  0x17   : > { %s712_s30 = scalar_lea.hbm %s858_s0, %s387_s27  ;;  %s137_s3 = scalar_lea.vmem [#allocation2], %s386_s26 }
  0x18   : > { %s145_s4 = sshll.u32 %s137_s3, 4  ;;  %p720_p13 = pnand %p421_p12, %p680_p4  ;;  %s716_s4 = int_to_ptr.vmem [resolvable:$true] %s145_s4 }
  0x19   : > { %s134_s6 = scalar_lea.sflag [#allocation3], %s703_s25  ;;  %s473_s7 = scalar_lea.hbm %s712_s30, 128 }
  0x1a   : > { %p474_p2 = scmp.ne.s32.totalorder %s712_s30, %s473_s7  ;;  %p475_p3 = pneg %p720_p13 }
  0x1b   : > { %s478_s16 = scalar_lea.hbm %s858_s0, 512  ;;  %p479_p4 = scmp.lt.u32.totalorder %s712_s30, %s858_s0 }
  0x1c   : > { %p476_p5 = pnand %p475_p3, %p474_p2  ;;  %p480_p7 = scmp.lt.u32.totalorder %s478_s16, %s473_s7 }
  0x1d   : > { %p482_p12 = scmp.lt.u32.totalorder %s473_s7, %s712_s30 }
  0x1e   : > { %p477_p6 = pneg %p476_p5  ;;  %p481_p10 = por %p480_p7, %p479_p4 }
  0x20   : > { %p483_p0 = por %p482_p12, %p481_p10 }
  0x22   : > { %p484_p1 = pnand %p483_p0, %p477_p6 }
  0x24   : > { %487 = shalt.err (!%p484_p1)
}
  0x25   : > { %s488_s20 = scalar_lea.vmem %s716_s4, 128  ;;  %s621_s28 = smov [#allocation2]  }
  0x26   : > { %p489_p2 = scmp.ne.s32.totalorder %s716_s4, %s488_s20  ;;  %s493_s29 = sshll.u32 %s621_s28, 4  ;;  %s494_s29 = int_to_ptr.vmem [resolvable:$false] %s493_s29 }
  0x27   : > { %s495_s3 = scalar_lea.vmem %s494_s29, 256  ;;  %p496_p9 = scmp.lt.s32.totalorder %s716_s4, %s494_s29 }
  0x28   : > { %p491_p5 = pnand %p489_p2, %p475_p3  ;;  %p497_p4 = scmp.lt.s32.totalorder %s495_s3, %s488_s20 }
  0x2a   : > { %p492_p11 = pneg %p491_p5  ;;  %p498_p7 = por %p497_p4, %p496_p9 }
  0x2c   : > { %p499_p10 = pnand %p498_p7, %p492_p11 }
  0x2e   : > { %502 = shalt.err (!%p499_p10)
}
  0x2f   : > { %413 = dma.hbm_to_vmem [thread:$0]  (!%p720_p13), %s712_s30, 128, %s716_s4, %s134_s6  }
  0x30   : > { %p868_p0 = scmp.lt.s32.totalorder %s619_s14, 5  ;;  %p869_p1 = scmp.ge.s32.totalorder %s619_s14, 1 }
  0x31   : > { %s765_s16 = scalar_lea.hbm %s859_s1, %s387_s27  ;;  %s156_s18 = scalar_lea.vmem [#allocation5], %s386_s26 }
  0x32   : > { %p756_p6 = pnand %p869_p1, %p868_p0  ;;  %s164_s19 = sshll.u32 %s156_s18, 4  ;;  %s165_s19 = int_to_ptr.vmem [resolvable:$true] %s164_s19 }
  0x33   : > { %s153_s30 = scalar_lea.sflag [#allocation6], %s703_s25  ;;  %s503_s4 = scalar_lea.hbm %s765_s16, 128 }
  0x34   : > { %s870_s7 = scalar_select %p756_p6, 1, 0 }
  0x35   : > { %p504_p9 = scmp.ne.s32.totalorder %s765_s16, %s503_s4  ;;  %s508_s27 = scalar_lea.hbm %s859_s1, 512 }
  0x36   : > { %p509_p2 = scmp.lt.u32.totalorder %s765_s16, %s859_s1  ;;  %p510_p5 = scmp.lt.u32.totalorder %s508_s27, %s503_s4 }
  0x37   : > { %p506_p11 = pnand %p504_p9, %p475_p3  ;;  %p512_p7 = scmp.lt.u32.totalorder %s503_s4, %s765_s16 }
  0x38   : > { %p511_p4 = por %p510_p5, %p509_p2 }
  0x39   : > { %p507_p12 = pneg %p506_p11 }
  0x3a   : > { %p513_p10 = por %p512_p7, %p511_p4 }
  0x3c   : > { %p514_p0 = pnand %p513_p10, %p507_p12 }
  0x3e   : > { %517 = shalt.err (!%p514_p0)
}
  0x3f   : > { %s518_s25 = scalar_lea.vmem %s165_s19, 128  ;;  %s622_s26 = smov [#allocation5]  }
  0x40   : > { %p519_p1 = scmp.ne.s32.totalorder %s165_s19, %s518_s25  ;;  %s523_s3 = sshll.u32 %s622_s26, 4  ;;  %s524_s3 = int_to_ptr.vmem [resolvable:$false] %s523_s3 }
  0x41   : > { %s525_s8 = scalar_lea.vmem %s524_s3, 256  ;;  %p526_p8 = scmp.lt.s32.totalorder %s165_s19, %s524_s3 }
  0x42   : > { %p521_p9 = pnand %p519_p1, %p475_p3  ;;  %p527_p6 = scmp.lt.s32.totalorder %s525_s8, %s518_s25 }
  0x44   : > { %p522_p11 = pneg %p521_p9  ;;  %p528_p2 = por %p527_p6, %p526_p8 }
  0x46   : > { %p529_p5 = pnand %p528_p2, %p522_p11 }
  0x48   : > { %532 = shalt.err (!%p529_p5)
}
  0x49   : > { %416 = dma.hbm_to_vmem [thread:$0]  (!%p720_p13), %s765_s16, 128, %s165_s19, %s153_s30  }
  0x4a   : > { %p871_p12 = scmp.ne.s32.totalorder %s870_s7, 0 }
  0x4b   : > { %s792_s15 = sand.u32 (!%p871_p12), 1, %s603_s10   ;;  %p872_p3 = scmp.ne.s32.totalorder (!%p871_p12), %s864_s21, 0 }
  0x4c   : > { %173 = sbr.rel (%p871_p12) target bundleno = 396 (0x18c), region = 28  ;;  %s391_s18 = sshll.u32 (!%p871_p12), %s792_s15, 3 }
  0x4d   : > { %s176_s4 = scalar_lea.sflag (!%p871_p12), [#allocation3], %s792_s15  ;;  %s179_s6 = scalar_lea.vmem (!%p871_p12), [#allocation2], %s391_s18 }
  0x53   : > { %586 = dma.done.wait (%p872_p3), %s176_s4, 128  }
  0x54   : > { %588 = vsyncadd (%p872_p3), %s176_s4, 4294967168  ;;  %s185_s5 = scalar_lea.sflag [#allocation6], %s792_s15  ;;  %s188_s16 = scalar_lea.vmem [#allocation5], %s391_s18 }
  0x55   : > { %590 = dma.done.wait (%p872_p3), %s185_s5, 128  }
  0x56   : > { %592 = vsyncadd (%p872_p3), %s185_s5, 4294967168  ;;  %v217_v0 = vlaneseq  ;;  %v214_v5 = vld [vmem:[%s188_s16] sm:$0xff]  ;;  %v213_v6 = vld [vmem:[%s179_s6] sm:$0xff]  ;;  %s393_s3 = sshll.u32 %s611_s12, 4  ;;  %s212_s18 = scalar_lea.vmem [#allocation7], %s792_s15 }
  0x57   : > { %247 = vadd.xlane.f32.xlu1 %v214_v5  ;;  %v215_v7 = vmax.f32 %v213_v6, 1e-07  ;;  %s283_s4 = sshll.u32 %s212_s18, 4  ;;  %p873_p13 = scmp.ne.s32.totalorder %s865_s22, 0  ;;  %s812_s4 = int_to_ptr.vmem [resolvable:$true] %s283_s4 }
  0x58   : > { %v218_v1 = vshrl.u32 %v217_v0, 7  ;;  %v220_v2 = vand.u32 127, %v217_v0  ;;  %s623_s12 = smov [#allocation7]  }
  0x59   : > { %v216_v8 = vmin.f32 %v215_v7, 0.9999999 }
  0x5a   : > { %v224_v3 = vmul.u32 128, %v218_v1 }
  0x5c   : > { %v225_v4 = vadd.s32 %v224_v3, %v220_v2 }
  0x5e   : > { %vm226_vm0 = vcmp.lt.s32.totalorder %v225_v4, 256 }
  0x5f   : > { %v227_v9 = vsel %vm226_vm0, %v216_v8, 0.0 }
  0x60   : > { %v228_v10 = vmul.f32 %v227_v9, %v214_v5 }
  0x62   : > { %229 = vadd.xlane.f32.xlu0 %v228_v10 }
  0x66   : > { %238 = vadd.xlane.f32.xlu0 %v227_v9 }
  0xe4   : > { %v248_v11 = vpop.xlane.xlu1 %247 }
  0xe5   : > { %v249_v12 = vrot.slane %v248_v11, 4 }
  0xe7   : > { %v250_v13 = vadd.f32 %v249_v12, %v248_v11 }
  0xe9   : > { %v251_v17 = vrot.slane %v250_v13, 2 }
  0xeb   : > { %v252_v23 = vadd.f32 %v251_v17, %v250_v13 }
  0xed   : > { %v253_v28 = vrot.slane %v252_v23, 1 }
  0xef   : > { %v230_v14 = vpop.xlane.xlu0 %229  ;;  %v254_v31 = vadd.f32 %v253_v28, %v252_v23 }
  0xf0   : > { %v231_v15 = vrot.slane %v230_v14, 4 }
  0xf2   : > { %v232_v16 = vadd.f32 %v231_v15, %v230_v14 }
  0xf3   : > { %v239_v18 = vpop.xlane.xlu0 %238 }
  0xf4   : > { %v233_v19 = vrot.slane %v232_v16, 2  ;;  %v240_v20 = vrot.slane %v239_v18, 4 }
  0xf6   : > { %v241_v21 = vadd.f32 %v240_v20, %v239_v18  ;;  %v234_v22 = vadd.f32 %v233_v19, %v232_v16 }
  0xf8   : > { %v242_v24 = vrot.slane %v241_v21, 2  ;;  %v235_v25 = vrot.slane %v234_v22, 1 }
  0xfa   : > { %v243_v26 = vadd.f32 %v242_v24, %v241_v21  ;;  %v236_v27 = vadd.f32 %v235_v25, %v234_v22 }
  0xfc   : > { %396 = vpush %v236_v27  ;;  %v244_v29 = vrot.slane %v243_v26, 1 }
  0xfe   : > { %v245_v30 = vadd.f32 %v244_v29, %v243_v26 }
 0x100   : > { %398 = vpush %v245_v30 }
 0x101   : > { %400 = vpush %v254_v31 }
 0x12d   : > { %s397_s21 = spop %396 }
 0x12e   : > { %s258_s8 = sadd.f32 1e-07, %s397_s21 }
 0x131   : > { %s399_s7 = spop %398 }
 0x132   : > { %s257_s19 = ssub.f32 %s399_s7, %s397_s21  ;;  %s401_s30 = spop %400 }
 0x133   : > { %s256_s20 = ssub.f32 %s401_s30, %s397_s21  ;;  %s810_s30 = scalar_lea.hbm %s860_s2, %s393_s3 }
 0x134   : > { %s261_s28 = smul.f32 0.3, %s257_s19  ;;  %s271_s19 = scalar_lea.sflag [#allocation4], %s792_s15 }
 0x135   : > { %s259_s27 = smul.f32 0.7, %s256_s20  ;;  %s533_s20 = scalar_lea.vmem %s812_s4, 16 }
 0x136   : > { %p534_p8 = scmp.ne.s32.totalorder %s812_s4, %s533_s20 }
 0x137   : > { %s260_s29 = sadd.f32 %s397_s21, %s259_s27  ;;  %s537_s21 = sshll.u32 %s623_s12, 4  ;;  %s538_s21 = int_to_ptr.vmem [resolvable:$false] %s537_s21 }
 0x138   : > { %p535_p6 = pnand %p534_p8, %p873_p13  ;;  %s539_s27 = scalar_lea.vmem %s538_s21, 32 }
 0x139   : > { %s262_s25 = sadd.f32 %s261_s28, %s260_s29  ;;  %p540_p7 = scmp.lt.s32.totalorder %s812_s4, %s538_s21 }
 0x13a   : > { %p536_p4 = pneg %p535_p6  ;;  %p541_p10 = scmp.lt.s32.totalorder %s539_s27, %s533_s20 }
 0x13b   : > { %s263_s26 = sadd.f32 1e-07, %s262_s25 }
 0x13c   : > { %p542_p0 = por %p541_p10, %p540_p7 }
 0x13d   : > { %v264_v32 = vstv %s263_s26 }
 0x13e   : > { %471 = vrcp.f32 %v264_v32  ;;  %p543_p1 = pnand %p542_p0, %p536_p4 }
 0x148   : > { %v472_v33 = vpop.eup %471 }
 0x149   : > { %402 = vpush %v472_v33 }
 0x17a   : > { %s403_s6 = spop %402 }
 0x17b   : > { %s267_s5 = smul.f32 %s403_s6, %s258_s8 }
 0x17d   : > { %v268_v34 = vstv %s267_s5 }
 0x17e   : > { %269 = vst [vmem:[%s212_s18] sm:$0x1] %v268_v34 }
 0x17f   : > { %546 = shalt.err (!%p543_p1)
}
 0x180   : > { %s547_s15 = scalar_lea.hbm %s810_s30, 16  ;;  %s551_s25 = scalar_lea.hbm %s860_s2, 64 }
 0x181   : > { %p548_p9 = scmp.ne.s32.totalorder %s810_s30, %s547_s15  ;;  %p552_p5 = scmp.lt.u32.totalorder %s810_s30, %s860_s2 }
 0x182   : > { %p553_p12 = scmp.lt.u32.totalorder %s551_s25, %s547_s15  ;;  %p555_p8 = scmp.lt.u32.totalorder %s547_s15, %s810_s30 }
 0x183   : > { %p549_p11 = pnand %p548_p9, %p873_p13 }
 0x184   : > { %p554_p3 = por %p553_p12, %p552_p5 }
 0x185   : > { %p550_p2 = pneg %p549_p11 }
 0x186   : > { %p556_p6 = por %p555_p8, %p554_p3 }
 0x188   : > { %p557_p4 = pnand %p556_p6, %p550_p2 }
 0x18a   : > { %560 = shalt.err (!%p557_p4)
}
 0x18b   : > { %408 = dma.vmem_to_hbm [thread:$0]  (%p873_p13), %s812_s4, 16, %s810_s30, %s271_s19  }
 0x18c PF: > { %p422_p7 = scmp.ge.s32.totalorder %s619_s14, 2  ;;  %s295_s8 = sand.u32 1, %s599_s9  }
 0x18d   : > { %p874_p10 = scmp.ne.s32.totalorder %s866_s24, 0  ;;  %s296_s18 = scalar_lea.sflag [#allocation4], %s295_s8 }
 0x18f   : > { %p418_p0 = pnand %p422_p7, %p874_p10 }
 0x191   : > { %594 = dma.done.wait (!%p418_p0), %s296_s18, 16  }
 0x192   : > { %596 = vsyncadd (!%p418_p0), %s296_s18, 4294967280  ;;  %s21_s14 = sadd.s32 1, %s619_s14   ;;  %s875_s9 = smov %s603_s10 }
 0x193   : > { %p18_p1 = scmp.ge.s32.totalorder %s21_s14, 6   ;;  %s876_s10 = smov %s607_s11 }
 0x194   : > { %s877_s11 = smov %s695_s23  ;;  %s878_s12 = smov %s615_s13 }
 0x195   : > { %s879_s13 = smov %s881_s17  ;;  %20 = sbr.rel (!%p18_p1) target bundleno = 8 (0x8), region = 86 }
 0x19c   :  { %300 = vsyncpa [#allocation3], 1 }
 0x19d   :  { %302 = vsyncpa [#allocation3 + $0x1], 1 }
 0x19e   :  { %303 = vsyncpa [#allocation6], 1 }
 0x19f   :  { %305 = vsyncpa [#allocation6 + $0x1], 1 }
 0x1a0   :  { %306 = vsyncpa [#allocation4], 1 }
 0x1a1   :  { %308 = vsyncpa [#allocation4 + $0x1], 1 }

</bundles_post_ra>
